<compile_context>
chip_gen: v7x
topology: tpu7x:2x2x1
jax: 0.10.0
libtpu: 0.0.40
codegen_flags: <defaults>
</compile_context>

<pallas_src>
import functools

import jax
import jax.numpy as jnp
from jax.experimental import pallas as pl
from jax.experimental.pallas import tpu as pltpu


_VMEM_TARGET = 40 * 2**20              # safe on v7x (64 MiB physical) with headroom
_WEIGHT_SINGLE_BUFFER_THRESH = 8 * 2**20


def _round_up(x, m):
    return ((x + m - 1) // m) * m


def _cdiv(a, b):
    return -(-a // b)


# --------------------------------------------------------------------------
# Fused kernel: x_ref [TM, Kp] (bf16), then (w_i [Kp_i, Np_i] bf16,
# b_i [1, Np_i] f32) per layer, then o_ref [TM, Np_last].
# Layer loop unrolled at trace time; activation never leaves VMEM/vregs.
# --------------------------------------------------------------------------
def _fused_mlp_kernel(x_ref, *refs, num_layers):
    o_ref = refs[-1]
    h = x_ref[...]                                   # bf16
    for i in range(num_layers):
        w = refs[2 * i][...]                         # bf16
        b = refs[2 * i + 1][...]                     # f32
        acc = jnp.dot(h, w, preferred_element_type=jnp.float32) + b
        if i < num_layers - 1:                       # compile-time branch
            h = jnp.maximum(acc, 0.0).astype(jnp.bfloat16)
        else:
            h = acc
    o_ref[...] = h.astype(o_ref.dtype)


def _resident_spec(shape, single_buffer):
    """BlockSpec for a layer-resident tensor (constant index_map)."""
    index_map = lambda i: (0,) * len(shape)
    if single_buffer:
        try:
            # Constant index_map => double buffering is pure VMEM waste.
            return pl.BlockSpec(shape, index_map, pipeline_mode=pl.Buffered(1))
        except Exception:   # pipeline_mode unsupported in this jax version
            pass
    return pl.BlockSpec(shape, index_map)


# --------------------------------------------------------------------------
# Fallback: single Linear (+ optional ReLU) as a tiled (M, N, K) matmul kernel.
# Used only when the padded weights cannot all stay resident (e.g. huge FFN on
# v7x's 64 MiB VMEM) -- weight blocks are streamed / overlapped with MXU work.
# --------------------------------------------------------------------------
def _linear_kernel(x_ref, w_ref, b_ref, o_ref, acc_ref, *, apply_relu):
    @pl.when(pl.program_id(2) == 0)
    def _():
        acc_ref[...] = jnp.zeros_like(acc_ref)

    acc_ref[...] += jnp.dot(x_ref[...], w_ref[...],
                            preferred_element_type=jnp.float32)

    @pl.when(pl.program_id(2) == pl.num_programs(2) - 1)
    def _():
        r = acc_ref[...] + b_ref[...]
        if apply_relu:
            r = jnp.maximum(r, 0.0)
        o_ref[...] = r.astype(o_ref.dtype)


def _linear_pallas(x, w_t, b, *, apply_relu, out_dtype):
    M, Kp = x.shape
    _, Np = w_t.shape
    TM = min(512, _round_up(M, 8))
    TN = 512 if Np % 512 == 0 else (256 if Np % 256 == 0 else 128)
    TK = 512 if Kp % 512 == 0 else (256 if Kp % 256 == 0 else 128)
    grid = (_cdiv(M, TM), Np // TN, Kp // TK)

    needed = (2 * (TM * TK * x.dtype.itemsize
                   + TK * TN * w_t.dtype.itemsize
                   + TN * 4
                   + TM * TN * jnp.dtype(out_dtype).itemsize)
              + TM * TN * 4)
    vmem_limit = int(min(max(needed * 1.5, 32 * 2**20), 64 * 2**20))

    kernel = functools.partial(_linear_kernel, apply_relu=apply_relu)
    return pl.pallas_call(
        kernel,
        out_shape=jax.ShapeDtypeStruct((M, Np), out_dtype),
        grid=grid,
        in_specs=[
            pl.BlockSpec((TM, TK), lambda i, j, k: (i, k)),
            pl.BlockSpec((TK, TN), lambda i, j, k: (k, j)),
            pl.BlockSpec((1, TN), lambda i, j, k: (0, j)),
        ],
        out_specs=pl.BlockSpec((TM, TN), lambda i, j, k: (i, j)),
        scratch_shapes=[pltpu.VMEM((TM, TN), jnp.float32)],
        compiler_params=pltpu.CompilerParams(
            dimension_semantics=("parallel", "parallel", "arbitrary"),
            vmem_limit_bytes=vmem_limit,
        ),
    )(x, w_t, b)


# --------------------------------------------------------------------------
# One-time param preparation: transpose to (in, out), zero-pad both feature
# axes to multiples of 128 (lane-dense), and store weights in bf16.
# --------------------------------------------------------------------------
def prepare_mlp_params(params):
    """params: list of (W (out,in), b (out,)) in torch.nn.Linear layout."""
    prepped = []
    for w, b in params:
        n_out, n_in = w.shape
        kp = _round_up(n_in, 128)
        np_ = _round_up(n_out, 128)
        w_t = jnp.zeros((kp, np_), jnp.bfloat16).at[:n_in, :n_out].set(
            w.T.astype(jnp.bfloat16))
        b_p = jnp.zeros((1, np_), jnp.float32).at[0, :n_out].set(
            b.astype(jnp.float32))
        prepped.append((w_t, b_p))
    output_dim = params[-1][0].shape[0]
    return prepped, output_dim


# --------------------------------------------------------------------------
# Jitted forward.
# --------------------------------------------------------------------------
@functools.partial(jax.jit, static_argnums=(2,))
def _mlp_forward_jit(x, prepared, output_dim):
    lead_shape = x.shape[:-1]
    x2d = x.reshape(-1, x.shape[-1])
    M, K = x2d.shape
    out_dtype = x.dtype

    Kp = prepared[0][0].shape[0]            # padded input feature dim
    Np_last = prepared[-1][0].shape[1]      # padded output feature dim
    num_layers = len(prepared)

    # bf16 activations into the MXU; pad ONLY the feature axis (exact: padded
    # weight rows are zero).  No M padding -- Pallas handles the ragged edge
    # block and rows are independent, so garbage rows never touch valid output.
    xb = x2d.astype(jnp.bfloat16)
    if K != Kp:
        xb = jnp.pad(xb, ((0, 0), (0, Kp - K)))

    # ---- VMEM budgeting --------------------------------------------------
    weight_bytes = sum(w.size * w.dtype.itemsize + b.size * b.dtype.itemsize
                       for w, b in prepared)
    max_np = max(w.shape[1] for w, _ in prepared)
    # Single-buffer resident weights only when they dominate VMEM; for tiny
    # layers the default (double-buffered) path is kept.
    single_buffer_weights = 2 * weight_bytes > _WEIGHT_SINGLE_BUFFER_THRESH
    resident_bytes = (1 if single_buffer_weights else 2) * weight_bytes
    # Per-row activation footprint: double-buffered bf16 input tile,
    # double-buffered output tile, plus live f32 intermediates.
    per_row = 2 * Kp * 2 + 2 * Np_last * jnp.dtype(out_dtype).itemsize + 3 * 4 * max_np

    if resident_bytes + 8 * per_row > _VMEM_TARGET:
        # Weights too large to keep fully resident (v7x 64 MiB VMEM):
        # stream them layer-by-layer with the tiled matmul kernel.
        h = xb
        for i, (w_t, b_p) in enumerate(prepared):
            last = i == num_layers - 1
            h = _linear_pallas(h, w_t, b_p, apply_relu=not last,
                               out_dtype=out_dtype if last else jnp.bfloat16)
        out = h
    else:
        # ---- adaptive row tile --------------------------------------------
        TM = (_VMEM_TARGET - resident_bytes) // per_row
        TM = int(min(TM, 1024, _round_up(M, 8)))
        TM = max(8, TM - TM % 8)
        if _cdiv(M, TM) < 2 and TM > 8:
            # Give both v7x TensorCores a row tile to chew on.
            TM = max(8, _round_up((M + 1) // 2, 8))
        grid = (_cdiv(M, TM),)

        needed = resident_bytes + TM * per_row
        vmem_limit = int(min(max(needed * 1.5, 32 * 2**20), 64 * 2**20))

        in_specs = [pl.BlockSpec((TM, Kp), lambda i: (i, 0))]
        flat_params = []
        for w_t, b_p in prepared:
            kw, nw = w_t.shape
            in_specs.append(_resident_spec((kw, nw), single_buffer_weights))
            in_specs.append(_resident_spec((1, nw), single_buffer_weights))
            flat_params.extend([w_t, b_p])

        kernel = functools.partial(_fused_mlp_kernel, num_layers=num_layers)
        out = pl.pallas_call(
            kernel,
            out_shape=jax.ShapeDtypeStruct((M, Np_last), out_dtype),
            grid=grid,
            in_specs=in_specs,
            out_specs=pl.BlockSpec((TM, Np_last), lambda i: (i, 0)),
            compiler_params=pltpu.CompilerParams(
                dimension_semantics=("parallel",),
                vmem_limit_bytes=vmem_limit,
            ),
        )(xb, *flat_params)

    if Np_last != output_dim:
        out = out[:, :output_dim]
    return out.reshape(*lead_shape, output_dim)


def mlp_forward(x, prepared, output_dim):
    """x: [..., input_dim] -> [..., output_dim] (matches nn.Linear on last dim)."""
    return _mlp_forward_jit(x, prepared, output_dim)


# --------------------------------------------------------------------------
# Param init (same shapes / init as torch.nn.Linear) and pure-JAX reference.
# --------------------------------------------------------------------------
def init_mlp_params(key, input_dim, hidden_dim, output_dim, num_layers):
    h = [hidden_dim] * (num_layers - 1)
    dims_in = [input_dim] + h
    dims_out = h + [output_dim]
    params = []
    for n_in, n_out in zip(dims_in, dims_out):
        key, kw, kb = jax.random.split(key, 3)
        bound = 1.0 / jnp.sqrt(jnp.float32(n_in))
        # W matches torch.nn.Linear layout: (out_features, in_features)
        w = jax.random.uniform(kw, (n_out, n_in), jnp.float32, -bound, bound)
        b = jax.random.uniform(kb, (n_out,), jnp.float32, -bound, bound)
        params.append((w, b))
    return params


def mlp_reference(x, params):
    num_layers = len(params)
    for i, (w, b) in enumerate(params):
        x = jnp.dot(x, w.T) + b
        if i < num_layers - 1:
            x = jnp.maximum(x, 0.0)
    return x


if __name__ == "__main__":
    # Small shapes consistent with the module (e.g. DETR bbox-head MLP):
    batch, seq = 2, 8
    input_dim, hidden_dim, output_dim, num_layers = 32, 32, 8, 3

    key = jax.random.PRNGKey(0)
    key, kx = jax.random.split(key)
    x = jax.random.normal(kx, (batch, seq, input_dim), jnp.float32)

    params = init_mlp_params(key, input_dim, hidden_dim, output_dim, num_layers)
    prepared, out_dim = prepare_mlp_params(params)

    out = mlp_forward(x, prepared, out_dim)
    out = jax.block_until_ready(out)

    ref = mlp_reference(x, params)
    assert out.shape == (batch, seq, output_dim), out.shape
    # bf16 MXU inputs with f32 accumulate => loosened tolerance vs f32 reference.
    max_err = float(jnp.max(jnp.abs(out - ref)))
    assert max_err < 5e-2, max_err
    print("KERNEL_OK")
</pallas_src>

<mosaic_0001>
module attributes {stable_mosaic.version = 11 : i64} {
  func.func @_fused_mlp_kernel(%arg0: i32, %arg1: memref<8x128xbf16, #tpu.memory_space<vmem>>, %arg2: memref<128x128xbf16, #tpu.memory_space<vmem>>, %arg3: memref<1x128xf32, #tpu.memory_space<vmem>>, %arg4: memref<128x128xbf16, #tpu.memory_space<vmem>>, %arg5: memref<1x128xf32, #tpu.memory_space<vmem>>, %arg6: memref<128x128xbf16, #tpu.memory_space<vmem>>, %arg7: memref<1x128xf32, #tpu.memory_space<vmem>>, %arg8: memref<8x128xf32, #tpu.memory_space<vmem>>) attributes {dimension_semantics = [#tpu.dimension_semantics<parallel>], iteration_bounds = array<i64: 2>, scalar_prefetch = 0 : i64, scratch_operands = 0 : i64, tpu.core_type = #tpu.core_type<tc>, window_params = [{transform_indices = @transform_0, window_bounds = array<i64: 8, 128>}, {pipeline_mode = #tpu.pipeline_mode<synchronous>, transform_indices = @transform_1, window_bounds = array<i64: 128, 128>}, {pipeline_mode = #tpu.pipeline_mode<synchronous>, transform_indices = @transform_2, window_bounds = array<i64: 1, 128>}, {pipeline_mode = #tpu.pipeline_mode<synchronous>, transform_indices = @transform_3, window_bounds = array<i64: 128, 128>}, {pipeline_mode = #tpu.pipeline_mode<synchronous>, transform_indices = @transform_4, window_bounds = array<i64: 1, 128>}, {pipeline_mode = #tpu.pipeline_mode<synchronous>, transform_indices = @transform_5, window_bounds = array<i64: 128, 128>}, {pipeline_mode = #tpu.pipeline_mode<synchronous>, transform_indices = @transform_6, window_bounds = array<i64: 1, 128>}, {transform_indices = @transform_7, window_bounds = array<i64: 8, 128>}]} {
    %c0 = arith.constant 0 : index
    %c0_0 = arith.constant 0 : index
    %0 = vector.load %arg1[%c0, %c0_0] : memref<8x128xbf16, #tpu.memory_space<vmem>>, vector<8x128xbf16>
    %c0_1 = arith.constant 0 : index
    %c0_2 = arith.constant 0 : index
    %1 = vector.load %arg2[%c0_1, %c0_2] : memref<128x128xbf16, #tpu.memory_space<vmem>>, vector<128x128xbf16>
    %c0_3 = arith.constant 0 : index
    %c0_4 = arith.constant 0 : index
    %2 = vector.load %arg3[%c0_3, %c0_4] : memref<1x128xf32, #tpu.memory_space<vmem>>, vector<1x128xf32>
    %cst = arith.constant dense<0.000000e+00> : vector<8x128xf32>
    %3 = tpu.matmul %0, %1, %cst {dimension_numbers = #tpu.dot_dimension_numbers<[1], [0], [0], [1], [0, 0, 1, 1], [], []>} : vector<8x128xbf16>, vector<128x128xbf16>, vector<8x128xf32> -> vector<8x128xf32>
    %4 = vector.broadcast %2 : vector<1x128xf32> to vector<8x128xf32>
    %5 = arith.addf %3, %4 : vector<8x128xf32>
    %cst_5 = arith.constant 0.000000e+00 : f32
    %6 = vector.broadcast %cst_5 : f32 to vector<8x128xf32>
    %7 = arith.maximumf %5, %6 : vector<8x128xf32>
    %8 = arith.truncf %7 : vector<8x128xf32> to vector<8x128xbf16>
    %c0_6 = arith.constant 0 : index
    %c0_7 = arith.constant 0 : index
    %9 = vector.load %arg4[%c0_6, %c0_7] : memref<128x128xbf16, #tpu.memory_space<vmem>>, vector<128x128xbf16>
    %c0_8 = arith.constant 0 : index
    %c0_9 = arith.constant 0 : index
    %10 = vector.load %arg5[%c0_8, %c0_9] : memref<1x128xf32, #tpu.memory_space<vmem>>, vector<1x128xf32>
    %cst_10 = arith.constant dense<0.000000e+00> : vector<8x128xf32>
    %11 = tpu.matmul %8, %9, %cst_10 {dimension_numbers = #tpu.dot_dimension_numbers<[1], [0], [0], [1], [0, 0, 1, 1], [], []>} : vector<8x128xbf16>, vector<128x128xbf16>, vector<8x128xf32> -> vector<8x128xf32>
    %12 = vector.broadcast %10 : vector<1x128xf32> to vector<8x128xf32>
    %13 = arith.addf %11, %12 : vector<8x128xf32>
    %cst_11 = arith.constant 0.000000e+00 : f32
    %14 = vector.broadcast %cst_11 : f32 to vector<8x128xf32>
    %15 = arith.maximumf %13, %14 : vector<8x128xf32>
    %16 = arith.truncf %15 : vector<8x128xf32> to vector<8x128xbf16>
    %c0_12 = arith.constant 0 : index
    %c0_13 = arith.constant 0 : index
    %17 = vector.load %arg6[%c0_12, %c0_13] : memref<128x128xbf16, #tpu.memory_space<vmem>>, vector<128x128xbf16>
    %c0_14 = arith.constant 0 : index
    %c0_15 = arith.constant 0 : index
    %18 = vector.load %arg7[%c0_14, %c0_15] : memref<1x128xf32, #tpu.memory_space<vmem>>, vector<1x128xf32>
    %cst_16 = arith.constant dense<0.000000e+00> : vector<8x128xf32>
    %19 = tpu.matmul %16, %17, %cst_16 {dimension_numbers = #tpu.dot_dimension_numbers<[1], [0], [0], [1], [0, 0, 1, 1], [], []>} : vector<8x128xbf16>, vector<128x128xbf16>, vector<8x128xf32> -> vector<8x128xf32>
    %20 = vector.broadcast %18 : vector<1x128xf32> to vector<8x128xf32>
    %21 = arith.addf %19, %20 : vector<8x128xf32>
    %c0_17 = arith.constant 0 : index
    %c0_18 = arith.constant 0 : index
    %22 = vector.load %arg8[%c0_17, %c0_18] : memref<8x128xf32, #tpu.memory_space<vmem>>, vector<8x128xf32>
    tpu.vector_store %arg8[%c0_17, %c0_18], %21 {strides = array<i32>} : memref<8x128xf32, #tpu.memory_space<vmem>>, vector<8x128xf32>,
    return
  }
  func.func @transform_0(%arg0: i32) -> (i32, i32) {
    %c0_i32 = arith.constant 0 : i32
    %c0_i32_0 = arith.constant 0 : i32
    return %arg0, %c0_i32 : i32, i32
  }
  func.func @transform_1(%arg0: i32) -> (i32, i32) {
    %c0_i32 = arith.constant 0 : i32
    %c0_i32_0 = arith.constant 0 : i32
    %c0_i32_1 = arith.constant 0 : i32
    return %c0_i32, %c0_i32_0 : i32, i32
  }
  func.func @transform_2(%arg0: i32) -> (i32, i32) {
    %c0_i32 = arith.constant 0 : i32
    %c0_i32_0 = arith.constant 0 : i32
    %c0_i32_1 = arith.constant 0 : i32
    return %c0_i32, %c0_i32_0 : i32, i32
  }
  func.func @transform_3(%arg0: i32) -> (i32, i32) {
    %c0_i32 = arith.constant 0 : i32
    %c0_i32_0 = arith.constant 0 : i32
    %c0_i32_1 = arith.constant 0 : i32
    return %c0_i32, %c0_i32_0 : i32, i32
  }
  func.func @transform_4(%arg0: i32) -> (i32, i32) {
    %c0_i32 = arith.constant 0 : i32
    %c0_i32_0 = arith.constant 0 : i32
    %c0_i32_1 = arith.constant 0 : i32
    return %c0_i32, %c0_i32_0 : i32, i32
  }
  func.func @transform_5(%arg0: i32) -> (i32, i32) {
    %c0_i32 = arith.constant 0 : i32
    %c0_i32_0 = arith.constant 0 : i32
    %c0_i32_1 = arith.constant 0 : i32
    return %c0_i32, %c0_i32_0 : i32, i32
  }
  func.func @transform_6(%arg0: i32) -> (i32, i32) {
    %c0_i32 = arith.constant 0 : i32
    %c0_i32_0 = arith.constant 0 : i32
    %c0_i32_1 = arith.constant 0 : i32
    return %c0_i32, %c0_i32_0 : i32, i32
  }
  func.func @transform_7(%arg0: i32) -> (i32, i32) {
    %c0_i32 = arith.constant 0 : i32
    %c0_i32_0 = arith.constant 0 : i32
    return %arg0, %c0_i32 : i32, i32
  }
}

</mosaic_0001>

<bundles_post_ra>
// kernel: _mlp_forward_jit.1
= control target key start
LH: loop header
LB: loop body
LE: loop exit
PB: predicated region body
PF: predicated region fallthrough
CT: control target
= control target key end

     0   :  { %12 = vsyncpa [#allocation3], 0  ;;  %s1255_s0 = inlined_call_operand.vmem [shape: bf16[16,128], index: 0, kind: input, shape index: {}]   ;;  %s1256_s1 = inlined_call_operand.hbm [shape: bf16[128,128], index: 1, kind: input, shape index: {}]   ;;  %s1257_s2 = inlined_call_operand.vmem [shape: f32[1,128], index: 2, kind: input, shape index: {}]   ;;  %s1258_s3 = inlined_call_operand.hbm [shape: bf16[128,128], index: 3, kind: input, shape index: {}]   ;;  %s1259_s4 = inlined_call_operand.vmem [shape: f32[1,128], index: 4, kind: input, shape index: {}]   ;;  %s1260_s5 = inlined_call_operand.hbm [shape: bf16[128,128], index: 5, kind: input, shape index: {}]   ;;  %s1261_s6 = inlined_call_operand.vmem [shape: f32[1,128], index: 6, kind: input, shape index: {}]   ;;  %s1262_s7 = inlined_call_operand.vmem [shape: f32[16,128], index: 7, kind: output, shape index: {}]  }
   0x1   :  { %13 = vsyncpa [#allocation5], 0  ;;  %s1085_s24 = smov 0  }
   0x2 LB: > { %s1091_s25 = sadd.s32 4294967295, %s1036_s24   ;;  %p744_p0 = scmp.ge.s32.totalorder %s1036_s24, 1  ;;  %s1036_s24 = sphi %s1085_s24, %s19_s24  }
   0x3   : > { %p202_p1 = scmp.lt.s32.totalorder %s1036_s24, 3  ;;  %p1263_p2 = scmp.eq.s32.totalorder %s1091_s25, 0 }
   0x4   : > { %s1038_s27 = smov [#allocation4]   ;;  %s1039_s29 = smov [#allocation2]  }
   0x5   : > { %p1096_p3 = pnand %p744_p0, %p202_p1  ;;  %s230_s28 = sshll.u32 %s1038_s27, 4  ;;  %s231_s28 = int_to_ptr.vmem [resolvable:$true] %s230_s28 }
   0x6   : > { %s214_s30 = sshll.u32 %s1039_s29, 4  ;;  %s1040_s9 = smov [#allocation6]   ;;  %s1108_s30 = int_to_ptr.vmem [resolvable:$true] %s214_s30 }
   0x7   : > { %s1265_s26 = scalar_select %p1096_p3, 1, 0 }
   0x8   : > { %p883_p4 = pneg %p1096_p3  ;;  %s246_s10 = sshll.u32 %s1040_s9, 4  ;;  %s1110_s10 = int_to_ptr.vmem [resolvable:$true] %s246_s10 }
   0x9   : > { %s938_s13 = scalar_lea.hbm %s1258_s3, 1024 }
   0xa   : > { %p1104_p5 = pnand %p1263_p2, %p883_p4  ;;  %p939_p6 = scmp.ne.s32.totalorder %s1258_s3, %s938_s13 }
   0xb   : > { %p945_p10 = scmp.lt.u32.totalorder %s938_s13, %s1258_s3 }
   0xc   : > { %p1120_p7 = pneg %p1104_p5 }
   0xe   : > { %p941_p8 = pnand %p1120_p7, %p939_p6 }
  0x10   : > { %p942_p9 = pneg %p941_p8 }
  0x12   : > { %p947_p11 = pnand %p945_p10, %p942_p9 }
  0x14   : > { %950 = shalt.err (!%p947_p11)
}
  0x15   : > { %s951_s19 = scalar_lea.vmem %s231_s28, 1024  ;;  %p959_p1 = scmp.lt.s32.totalorder %s231_s28, %s231_s28 }
  0x16   : > { %p952_p12 = scmp.ne.s32.totalorder %s231_s28, %s951_s19  ;;  %p960_p4 = scmp.lt.s32.totalorder %s951_s19, %s951_s19 }
  0x18   : > { %p954_p13 = pnand %p952_p12, %p1120_p7  ;;  %p961_p2 = por %p960_p4, %p959_p1 }
  0x1a   : > { %p955_p0 = pneg %p954_p13 }
  0x1c   : > { %p962_p3 = pnand %p961_p2, %p955_p0 }
  0x1e   : > { %965 = shalt.err (!%p962_p3)
}
  0x1f   : > { %s1041_s20 = smov 64   ;;  %s1042_s21 = smov 4  }
  0x20   : > { %889 = dma.hbm_to_vmem [thread:$0]  (!%p1104_p5), %s1258_s3, 1024, %s231_s28, [#allocation5], %s1041_s20, %s1041_s20, %s1042_s21  }
  0x21   : > { %s966_s9 = scalar_lea.hbm %s1256_s1, 1024 }
  0x22   : > { %p967_p2 = scmp.ne.s32.totalorder %s1256_s1, %s966_s9  ;;  %p973_p8 = scmp.lt.u32.totalorder %s966_s9, %s1256_s1 }
  0x24   : > { %p969_p3 = pnand %p967_p2, %p1120_p7 }
  0x26   : > { %p970_p6 = pneg %p969_p3 }
  0x28   : > { %p975_p9 = pnand %p973_p8, %p970_p6 }
  0x2a   : > { %978 = shalt.err (!%p975_p9)
}
  0x2b   : > { %s979_s28 = scalar_lea.vmem %s1108_s30, 1024  ;;  %p987_p13 = scmp.lt.s32.totalorder %s1108_s30, %s1108_s30 }
  0x2c   : > { %p980_p10 = scmp.ne.s32.totalorder %s1108_s30, %s979_s28  ;;  %p988_p0 = scmp.lt.s32.totalorder %s979_s28, %s979_s28 }
  0x2e   : > { %p982_p11 = pnand %p980_p10, %p1120_p7  ;;  %p989_p1 = por %p988_p0, %p987_p13 }
  0x30   : > { %p983_p12 = pneg %p982_p11 }
  0x32   : > { %p990_p4 = pnand %p989_p1, %p983_p12 }
  0x34   : > { %993 = shalt.err (!%p990_p4)
}
  0x35   : > { %886 = dma.hbm_to_vmem [thread:$0]  (!%p1104_p5), %s1256_s1, 1024, %s1108_s30, [#allocation3], %s1041_s20, %s1041_s20, %s1042_s21  }
  0x36   : > { %s994_s22 = scalar_lea.hbm %s1260_s5, 1024 }
  0x37   : > { %p995_p2 = scmp.ne.s32.totalorder %s1260_s5, %s994_s22  ;;  %p1001_p8 = scmp.lt.u32.totalorder %s994_s22, %s1260_s5 }
  0x39   : > { %p997_p3 = pnand %p995_p2, %p1120_p7 }
  0x3b   : > { %p998_p6 = pneg %p997_p3 }
  0x3d   : > { %p1003_p9 = pnand %p1001_p8, %p998_p6 }
  0x3f   : > { %1006 = shalt.err (!%p1003_p9)
}
  0x40   : > { %s1007_s30 = scalar_lea.vmem %s1110_s10, 1024  ;;  %p1015_p13 = scmp.lt.s32.totalorder %s1110_s10, %s1110_s10 }
  0x41   : > { %p1008_p10 = scmp.ne.s32.totalorder %s1110_s10, %s1007_s30  ;;  %p1016_p0 = scmp.lt.s32.totalorder %s1007_s30, %s1007_s30 }
  0x43   : > { %p1010_p11 = pnand %p1008_p10, %p1120_p7  ;;  %p1017_p1 = por %p1016_p0, %p1015_p13 }
  0x45   : > { %p1011_p12 = pneg %p1010_p11 }
  0x47   : > { %p1018_p4 = pnand %p1017_p1, %p1011_p12 }
  0x49   : > { %1021 = shalt.err (!%p1018_p4)
}
  0x4a   : > { %892 = dma.hbm_to_vmem [thread:$0]  (!%p1104_p5), %s1260_s5, 1024, %s1110_s10, [#allocation5], %s1041_s20, %s1041_s20, %s1042_s21  }
  0x4b   : > { %p1268_p2 = scmp.ne.s32.totalorder %s1265_s26, 0 }
  0x4c   : > { %p1269_p7 = scmp.eq.s32.totalorder (!%p1268_p2), %s1091_s25, 0 }
  0x4d   : > { %272 = sbr.rel (%p1268_p2) target bundleno = 774 (0x306), region = 48 }
  0x54   : > { %1027 = dma.done.wait (%p1269_p7), [#allocation3], 1024   ;;  %p1270_p3 = pmov %p1269_p7 }
  0x56   : > { %1029 = vsyncadd (%p1270_p3), [#allocation3], 4294966272  ;;  %p1271_p6 = pmov %p1270_p3 }
  0x57   : > { %p1272_p8 = pmov %p1270_p3 }
  0x58   : > { %1031 = dma.done.wait (%p1271_p6), [#allocation5], 2048  }
  0x59   : > { %1033 = vsyncadd (%p1272_p8), [#allocation5], 4294965248  ;;  %v1043_v0 = vmov 0.0   ;;  %vm1044_vm0 = vmmov 0   ;;  %v914_v1 = vld [vmem:[#allocation2] sm:$0xff]   ;;  %v915_v2 = vld [vmem:[#allocation2 + $0x8] sm:$0xff]  }
  0x5a   : > { %811 = vmatprep.subr.bf16.mxu0 %v1043_v0  ;;  %827 = vmatprep.mubr.msk.bf16.mxu0 %vm1044_vm0, %v1043_v0  ;;  %v916_v3 = vld [vmem:[#allocation2 + $0x10] sm:$0xff]   ;;  %v922_v4 = vld [vmem:[#allocation4] sm:$0xff]   ;;  %v917_v5 = vld [vmem:[#allocation2 + $0x18] sm:$0xff]   ;;  %p310_p5 = scmp.lt.s32.totalorder %s1091_s25, 1 }
  0x5b   : > { %831 = vmatprep.subr.bf16.mxu1 %v1043_v0  ;;  %847 = vmatprep.mubr.msk.bf16.mxu1 %vm1044_vm0, %v1043_v0  ;;  %v923_v6 = vld [vmem:[#allocation4 + $0x8] sm:$0xff]   ;;  %v918_v7 = vld [vmem:[#allocation2 + $0x20] sm:$0xff]   ;;  %v924_v8 = vld [vmem:[#allocation4 + $0x10] sm:$0xff]  }
  0x5c   : > { %812 = vmatpush3.bf16.msra.mxu0 %v914_v1  ;;  %832 = vmatpush3.bf16.msra.mxu1 %v922_v4  ;;  %s1274_s25 = smov (!%p310_p5, %s1091_s25), 1  ;;  %v919_v9 = vld [vmem:[#allocation2 + $0x28] sm:$0xff]   ;;  %v925_v10 = vld [vmem:[#allocation4 + $0x18] sm:$0xff]   ;;  %v920_v11 = vld [vmem:[#allocation2 + $0x30] sm:$0xff]  }
  0x5d   : > { %813 = vmatprep.subr.bf16.mxu0 %v1043_v0  ;;  %833 = vmatprep.subr.bf16.mxu1 %v1043_v0  ;;  %v926_v12 = vld [vmem:[#allocation4 + $0x20] sm:$0xff]   ;;  %s753_s26 = sshll.u32 %s1274_s25, 2  ;;  %v921_v13 = vld [vmem:[#allocation2 + $0x38] sm:$0xff]   ;;  %v927_v14 = vld [vmem:[#allocation4 + $0x28] sm:$0xff]   ;;  %s754_s28 = sshll.u32 %s1274_s25, 3 }
  0x5e   : > { %s313_s16 = scalar_lea.vmem %s1255_s0, %s753_s26  ;;  %v928_v16 = vld [vmem:[#allocation4 + $0x30] sm:$0xff]   ;;  %v929_v17 = vld [vmem:[#allocation4 + $0x38] sm:$0xff]   ;;  %v930_v18 = vld [vmem:[#allocation6] sm:$0xff]   ;;  %s317_s22 = scalar_lea.vmem %s1262_s7, %s754_s28 }
  0x5f   : > { %v319_v15 = vld [vmem:[%s313_s16] sm:$0xf]  ;;  %v931_v19 = vld [vmem:[#allocation6 + $0x8] sm:$0xff]   ;;  %v932_v20 = vld [vmem:[#allocation6 + $0x10] sm:$0xff]  }
  0x60   : > { %814 = vmatpush3.bf16.msra.mxu0 %v915_v2  ;;  %834 = vmatpush3.bf16.msra.mxu1 %v923_v6  ;;  %v933_v21 = vld [vmem:[#allocation6 + $0x18] sm:$0xff]   ;;  %v934_v22 = vld [vmem:[#allocation6 + $0x20] sm:$0xff]   ;;  %v935_v23 = vld [vmem:[#allocation6 + $0x28] sm:$0xff]  }
  0x61   : > { %815 = vmatprep.subr.bf16.mxu0 %v1043_v0  ;;  %835 = vmatprep.subr.bf16.mxu1 %v1043_v0  ;;  %v755_v24 = vld [vmem:[%s1257_s2] ss:$0 sm:$0xff]  ;;  %v936_v32 = vld [vmem:[#allocation6 + $0x30] sm:$0xff]   ;;  %v937_v33 = vld [vmem:[#allocation6 + $0x38] sm:$0xff]  }
  0x62   : > { %v764_v34 = vld [vmem:[%s1259_s4] ss:$0 sm:$0xff] }
  0x63   : > { %v773_v42 = vld [vmem:[%s1261_s6] ss:$0 sm:$0xff] }
  0x64   : > { %816 = vmatpush3.bf16.msra.mxu0 %v916_v3  ;;  %836 = vmatpush3.bf16.msra.mxu1 %v924_v8 }
  0x65   : > { %817 = vmatprep.subr.bf16.mxu0 %v1043_v0  ;;  %837 = vmatprep.subr.bf16.mxu1 %v1043_v0 }
  0x68   : > { %818 = vmatpush3.bf16.msra.mxu0 %v917_v5  ;;  %838 = vmatpush3.bf16.msra.mxu1 %v925_v10 }
  0x69   : > { %819 = vmatprep.subr.bf16.mxu0 %v1043_v0  ;;  %839 = vmatprep.subr.bf16.mxu1 %v1043_v0 }
  0x6c   : > { %820 = vmatpush3.bf16.msra.mxu0 %v918_v7  ;;  %840 = vmatpush3.bf16.msra.mxu1 %v926_v12 }
  0x6d   : > { %821 = vmatprep.subr.bf16.mxu0 %v1043_v0  ;;  %841 = vmatprep.subr.bf16.mxu1 %v1043_v0 }
  0x70   : > { %822 = vmatpush3.bf16.msra.mxu0 %v919_v9  ;;  %842 = vmatpush3.bf16.msra.mxu1 %v927_v14 }
  0x71   : > { %823 = vmatprep.subr.bf16.mxu0 %v1043_v0  ;;  %843 = vmatprep.subr.bf16.mxu1 %v1043_v0 }
  0x74   : > { %824 = vmatpush3.bf16.msra.mxu0 %v920_v11  ;;  %844 = vmatpush3.bf16.msra.mxu1 %v928_v16 }
  0x75   : > { %825 = vmatprep.subr.bf16.mxu0 %v1043_v0  ;;  %845 = vmatprep.subr.bf16.mxu1 %v1043_v0 }
  0x78   : > { %826 = vmatpush3.bf16.msra.mxu0 %v921_v13  ;;  %846 = vmatpush3.bf16.msra.mxu1 %v929_v17 }
  0x79   : > { %851 = vmatprep.subr.bf16.mxu0 %v1043_v0 }
  0x7b   : > { %828 = vmatmul.mubr.bf16.vlgmr.msra.gmra.mrb[0].mxu0 %v319_v15 }
  0x7c   : > { %867 = vmatprep.mubr.msk.bf16.mxu0 %vm1044_vm0, %v1043_v0  ;;  %852 = vmatpush3.bf16.msra.mxu0 %v930_v18 }
  0x7d   : > { %853 = vmatprep.subr.bf16.mxu0 %v1043_v0 }
  0x80   : > { %854 = vmatpush3.bf16.msra.mxu0 %v931_v19 }
  0x81   : > { %855 = vmatprep.subr.bf16.mxu0 %v1043_v0 }
  0x84   : > { %856 = vmatpush3.bf16.msra.mxu0 %v932_v20 }
  0x85   : > { %857 = vmatprep.subr.bf16.mxu0 %v1043_v0 }
  0x88   : > { %858 = vmatpush3.bf16.msra.mxu0 %v933_v21 }
  0x89   : > { %859 = vmatprep.subr.bf16.mxu0 %v1043_v0 }
  0x8c   : > { %860 = vmatpush3.bf16.msra.mxu0 %v934_v22 }
  0x8d   : > { %861 = vmatprep.subr.bf16.mxu0 %v1043_v0 }
  0x90   : > { %862 = vmatpush3.bf16.msra.mxu0 %v935_v23 }
  0x91   : > { %863 = vmatprep.subr.bf16.mxu0 %v1043_v0 }
  0x94   : > { %864 = vmatpush3.bf16.msra.mxu0 %v936_v32 }
  0x95   : > { %865 = vmatprep.subr.bf16.mxu0 %v1043_v0 }
  0x98   : > { %866 = vmatpush3.bf16.msra.mxu0 %v937_v33 }
 0x14e   : > { %v425_v25 = vpop.f32.mrb[0].mxu0 }
 0x14f   : > { %v426_v26 = vadd.f32 %v755_v24, %v425_v25  ;;  %v829_v27 = vpop.f32.mrb[1].mxu0 }
 0x150   : > { %v428_v28 = vpop.f32.mrb[2].mxu0 }
 0x151   : > { %v431_v29 = vmax.f32 %v426_v26, 0.0  ;;  %v830_v30 = vpop.f32.mrb[3].mxu0 }
 0x153   : > { %v432_v31 = vpack.c.bf16 %v431_v29, %v431_v29 }
 0x155   : > { %848 = vmatmul.mubr.bf16.vlgmr.msra.gmra.mrb[0].mxu1 %v432_v31 }
 0x228   : > { %v538_v35 = vpop.f32.mrb[0].mxu1 }
 0x229   : > { %v539_v36 = vadd.f32 %v764_v34, %v538_v35  ;;  %v849_v37 = vpop.f32.mrb[1].mxu1 }
 0x22a   : > { %v541_v38 = vpop.f32.mrb[2].mxu1 }
 0x22b   : > { %v544_v39 = vmax.f32 %v539_v36, 0.0  ;;  %v850_v40 = vpop.f32.mrb[3].mxu1 }
 0x22d   : > { %v545_v41 = vpack.c.bf16 %v544_v39, %v544_v39 }
 0x22f   : > { %868 = vmatmul.mubr.bf16.vlgmr.msra.gmra.mrb[4].mxu0 %v545_v41 }
 0x302   : > { %v651_v43 = vpop.f32.mrb[4].mxu0 }
 0x303   : > { %v652_v44 = vadd.f32 %v773_v42, %v651_v43  ;;  %v869_v45 = vpop.f32.mrb[5].mxu0 }
 0x304   : > { %v654_v46 = vpop.f32.mrb[6].mxu0 }
 0x305   : > { %657 = vst [vmem:[%s317_s22] sm:$0xff] %v652_v44  ;;  %v870_v47 = vpop.f32.mrb[7].mxu0 }
 0x306 PF: > { %s19_s24 = sadd.s32 1, %s1036_s24  }
 0x307   : > { %p16_p9 = scmp.ge.s32.totalorder %s19_s24, 4  }
 0x309   :  { %18 = sbr.rel (!%p16_p9) target bundleno = 2 (0x2), region = 91 }
 0x310   :  { %677 = vsyncpa [#allocation3], 1 }
 0x311   :  { %679 = vsyncpa [#allocation3 + $0x1], 1 }
 0x312   :  { %680 = vsyncpa [#allocation5], 1 }

</bundles_post_ra>
